<compile_context>
chip_gen: v5e
topology: v5e:2x2
jax: 0.10.0
libtpu: 0.0.40
codegen_flags: <defaults>
</compile_context>

<pallas_src>
import jax
import jax.numpy as jnp
from jax import lax
from jax.experimental import pallas as pl
from jax.experimental.pallas import tpu as pltpu

_VMEM = pl.BlockSpec(memory_space=pltpu.MemorySpace.VMEM)
_EPS = 1e-12
_NEG_BIG = -1e30
_CBLK = 128          # lane-dense feature block
_HW_TILE = 512       # HW tile target (measured ~85% of HBM roofline)


def _round_up(x, m):
    return ((x + m - 1) // m) * m


# ---------------------------------------------------------------------------
# Kernel 1: superpixel projection  H = (Q^T @ X) * (1/colsum(Q))[:, None]
#   operands arrive pre-transposed / padded / bf16 from glue:
#     QT: (N, HW_pad) bf16,  X: (HW_pad, C_pad) bf16,  inv: (N, 1) f32
#   grid = (C_pad/128 "parallel", HW_pad/tile "arbitrary"); resident f32 acc.
# ---------------------------------------------------------------------------
def _superpixel_kernel(inv_ref, qt_ref, x_ref, h_ref):
    i = pl.program_id(1)

    @pl.when(i == 0)
    def _():
        h_ref[...] = jnp.zeros_like(h_ref)

    h_ref[...] += jnp.dot(qt_ref[...], x_ref[...],
                          preferred_element_type=jnp.float32)

    @pl.when(i == pl.num_programs(1) - 1)
    def _():
        h_ref[...] = h_ref[...] * inv_ref[...]


def superpixel_project(QT, X, inv_col, tile):
    N, HWp = QT.shape
    Cp = X.shape[1]
    return pl.pallas_call(
        _superpixel_kernel,
        out_shape=jax.ShapeDtypeStruct((N, Cp), jnp.float32),
        grid=(Cp // _CBLK, HWp // tile),
        in_specs=[pl.BlockSpec((N, 1), lambda c, i: (0, 0)),
                  pl.BlockSpec((N, tile), lambda c, i: (0, i)),
                  pl.BlockSpec((tile, _CBLK), lambda c, i: (i, c))],
        out_specs=pl.BlockSpec((N, _CBLK), lambda c, i: (0, c)),
        compiler_params=pltpu.CompilerParams(
            dimension_semantics=("parallel", "arbitrary"),
            vmem_limit_bytes=32 * 1024 * 1024),
    )(inv_col, QT, X)


# ---------------------------------------------------------------------------
# Kernel 2: fused dual-branch GCN layer + cosine-reweight + standardization
#   Each branch: BN -> (A_hat @ Hn) @ W + rowsum(A_hat)*b -> LeakyReLU
#   (reordered propagation; exactly equal to A_hat @ (Hn @ W + b)).
#   BN is training-mode batch stats with default-initialized affine
#   (gamma=1, beta=0), matching the reference module at init.
#   A_hat / W arrive bf16 from glue; accumulation is f32.
# ---------------------------------------------------------------------------
def _dual_gcn_fuse_kernel(h1_ref, h2_ref, a1_ref, a2_ref, rs1_ref, rs2_ref,
                          w1_ref, b1_ref, w2_ref, b2_ref, o1_ref, o2_ref):
    def branch(H, A_bf, rs, W_bf, b):
        mean = jnp.mean(H, axis=0, keepdims=True)
        msq = jnp.mean(H * H, axis=0, keepdims=True)
        var = jnp.maximum(msq - mean * mean, 0.0)
        Hn = (H - mean) * lax.rsqrt(var + 1e-5)
        AH = jnp.dot(A_bf, Hn.astype(jnp.bfloat16),
                     preferred_element_type=jnp.float32)
        out = jnp.dot(AH.astype(jnp.bfloat16), W_bf,
                      preferred_element_type=jnp.float32) + rs * b
        return jnp.where(out >= 0.0, out, 0.01 * out)  # LeakyReLU(0.01)

    G1 = branch(h1_ref[...], a1_ref[...], rs1_ref[...], w1_ref[...], b1_ref[...])
    G2 = branch(h2_ref[...], a2_ref[...], rs2_ref[...], w2_ref[...], b2_ref[...])

    # dot(): per-row cosine re-weight  w = exp(10*(1 - cos_sim)) - 1
    n1sq = jnp.sum(G1 * G1, axis=1, keepdims=True)
    n2sq = jnp.sum(G2 * G2, axis=1, keepdims=True)
    d12 = jnp.sum(G1 * G2, axis=1, keepdims=True)
    inv_mod = lax.rsqrt(jnp.maximum(n1sq * n2sq, _EPS * _EPS))
    cos = 1.0 - d12 * inv_mod
    w = jnp.exp(10.0 * cos) - 1.0
    T1 = G1 * w
    T2 = G2 * w

    # per-column standardization (StandardScaler, population std)
    def standardize(T):
        m = jnp.mean(T, axis=0, keepdims=True)
        msq = jnp.mean(T * T, axis=0, keepdims=True)
        var = jnp.maximum(msq - m * m, _EPS * _EPS)
        return (T - m) * lax.rsqrt(var)

    o1_ref[...] = standardize(T1)
    o2_ref[...] = standardize(T2)


def dual_gcn_fuse(H1, H2, A1b, A2b, rs1, rs2, W1, b1, W2, b2):
    # TODO(synk): cos_map (only logged when epoch % 1000 == 0, never used in
    # the returned Y) is not materialized.
    N = H1.shape[0]
    Dout = W1.shape[1]
    shape = jax.ShapeDtypeStruct((N, Dout), jnp.float32)
    return pl.pallas_call(
        _dual_gcn_fuse_kernel,
        out_shape=(shape, shape),
        in_specs=[_VMEM] * 10,
        out_specs=(_VMEM, _VMEM),
        compiler_params=pltpu.CompilerParams(
            vmem_limit_bytes=48 * 1024 * 1024),
    )(H1, H2, A1b, A2b, rs1, rs2,
      W1, b1.reshape(1, Dout), W2, b2.reshape(1, Dout))


# ---------------------------------------------------------------------------
# Kernel 3: output GCN layer (2048 -> 32, Din > Dout so keep original order)
#   fused with the head projection  P = H_out @ Wsoft_pad   -> [N, Cpad]
#   Wout / Wsoft padded to 128 lanes (zero columns / rows), bf16 from glue.
# ---------------------------------------------------------------------------
def _out_head_proj_kernel(h_ref, a_ref, w_ref, b_ref, wsoft_ref, p_ref):
    H = h_ref[...]
    mean = jnp.mean(H, axis=0, keepdims=True)
    msq = jnp.mean(H * H, axis=0, keepdims=True)
    var = jnp.maximum(msq - mean * mean, 0.0)
    Hn = (H - mean) * lax.rsqrt(var + 1e-5)
    lin = jnp.dot(Hn.astype(jnp.bfloat16), w_ref[...],
                  preferred_element_type=jnp.float32) + b_ref[...]
    out = jnp.dot(a_ref[...], lin.astype(jnp.bfloat16),
                  preferred_element_type=jnp.float32)
    out = jnp.where(out >= 0.0, out, 0.01 * out)
    p_ref[...] = jnp.dot(out.astype(jnp.bfloat16), wsoft_ref[...],
                         preferred_element_type=jnp.float32)


def out_layer_project(H, A_bf, Wout_pad, bout_pad, Wsoft_pad):
    N = H.shape[0]
    Cpad = Wsoft_pad.shape[1]
    return pl.pallas_call(
        _out_head_proj_kernel,
        out_shape=jax.ShapeDtypeStruct((N, Cpad), jnp.float32),
        in_specs=[_VMEM] * 5,
        out_specs=_VMEM,
        compiler_params=pltpu.CompilerParams(
            vmem_limit_bytes=48 * 1024 * 1024),
    )(H, A_bf, Wout_pad, bout_pad, Wsoft_pad)


# ---------------------------------------------------------------------------
# Kernel 4: head  Y = softmax( Q1 @ P + b_pad )  tiled over HW ("parallel").
#   Q1 padded to (HW_pad, N_pad) bf16, P padded to (N_pad, Cpad) bf16.
#   b_pad carries the real bias for valid classes and -1e30 for pad lanes.
# ---------------------------------------------------------------------------
def _head_kernel(q_ref, p_ref, bmask_ref, y_ref):
    logits = jnp.dot(q_ref[...], p_ref[...],
                     preferred_element_type=jnp.float32) + bmask_ref[...]
    m = jnp.max(logits, axis=-1, keepdims=True)
    e = jnp.exp(logits - m)
    y_ref[...] = e / jnp.sum(e, axis=-1, keepdims=True)


def head(Q1p, Pp, bmask, tile):
    HWp, Np = Q1p.shape
    Cpad = Pp.shape[1]
    return pl.pallas_call(
        _head_kernel,
        out_shape=jax.ShapeDtypeStruct((HWp, Cpad), jnp.float32),
        grid=(HWp // tile,),
        in_specs=[pl.BlockSpec((tile, Np), lambda i: (i, 0)),
                  pl.BlockSpec((Np, Cpad), lambda i: (0, 0)),
                  pl.BlockSpec((1, Cpad), lambda i: (0, 0))],
        out_specs=pl.BlockSpec((tile, Cpad), lambda i: (i, 0)),
        compiler_params=pltpu.CompilerParams(
            dimension_semantics=("parallel",),
            vmem_limit_bytes=32 * 1024 * 1024),
    )(Q1p, Pp, bmask)


# ---------------------------------------------------------------------------
# glue (constant precompute: padded / transposed / bf16 operands; orchestration)
# ---------------------------------------------------------------------------
def _normalize_adj(A):
    N = A.shape[0]
    Ai = A + jnp.eye(N, dtype=jnp.float32)
    d = jnp.sum(Ai, axis=1)
    r = d ** -0.5
    A_hat = (r[:, None] * Ai) * r[None, :]
    rs = jnp.sum(A_hat, axis=1, keepdims=True)  # rowsum(A_hat), for bias term
    return A_hat.astype(jnp.bfloat16), rs


def cegcn_forward(params, x1, x2, Q1, A1, Q2, A2, epoch=0, curr_seed=0):
    h1, w1, c1 = x1.shape
    h2, w2, c2 = x2.shape
    HW1, N1 = Q1.shape
    HW2, N2 = Q2.shape

    # ---- hoisted module constants (PyTorch computes these once as well) ----
    A1b, rs1 = _normalize_adj(A1)
    A2b, rs2 = _normalize_adj(A2)
    inv1 = (1.0 / jnp.maximum(jnp.sum(Q1, axis=0), _EPS)).reshape(-1, 1)
    inv2 = (1.0 / jnp.maximum(jnp.sum(Q2, axis=0), _EPS)).reshape(-1, 1)

    # lane-dense, HW-padded, bf16 streamed operands (Q is 0/1 -> bf16 exact)
    t1 = min(_HW_TILE, _round_up(HW1, 128))
    t2 = min(_HW_TILE, _round_up(HW2, 128))
    HW1p, HW2p = _round_up(HW1, t1), _round_up(HW2, t2)
    C1p, C2p = _round_up(c1, _CBLK), _round_up(c2, _CBLK)

    Q1T = jnp.zeros((N1, HW1p), jnp.bfloat16).at[:, :HW1].set(
        Q1.T.astype(jnp.bfloat16))
    Q2T = jnp.zeros((N2, HW2p), jnp.bfloat16).at[:, :HW2].set(
        Q2.T.astype(jnp.bfloat16))
    X1 = jnp.zeros((HW1p, C1p), jnp.bfloat16).at[:HW1, :c1].set(
        x1.reshape(HW1, c1).astype(jnp.bfloat16))
    X2 = jnp.zeros((HW2p, C2p), jnp.bfloat16).at[:HW2, :c2].set(
        x2.reshape(HW2, c2).astype(jnp.bfloat16))

    H1 = superpixel_project(Q1T, X1, inv1, t1)   # (N1, C1p) f32
    H2 = superpixel_project(Q2T, X2, inv2, t2)   # (N2, C2p) f32

    # stage-0 weights with Din zero-padded to the lane-dense channel block
    # (zero input columns stay exactly zero through BN, so the pad is inert)
    W1a = jnp.zeros((C1p, 512), jnp.bfloat16).at[:c1].set(
        params["W1a"].astype(jnp.bfloat16))
    W2a = jnp.zeros((C2p, 512), jnp.bfloat16).at[:c2].set(
        params["W2a"].astype(jnp.bfloat16))

    # stage 0 (channel -> 512) both branches + cosine fuse, one kernel
    H1, H2 = dual_gcn_fuse(H1, H2, A1b, A2b, rs1, rs2,
                           W1a, params["b1a"], W2a, params["b2a"])
    # stage 1 (512 -> 1024) both branches + cosine fuse, one kernel
    H1, H2 = dual_gcn_fuse(H1, H2, A1b, A2b, rs1, rs2,
                           params["W1b"].astype(jnp.bfloat16), params["b1b"],
                           params["W2b"].astype(jnp.bfloat16), params["b2b"])

    H = jnp.concatenate([H1, H2], axis=1)  # [N, 2048]

    class_count = params["Wsoft"].shape[1]
    Dh = params["Wout"].shape[1]                       # 32-wide hidden
    Dhp = _round_up(Dh, 128)                           # lane-dense hidden
    Cpad = _round_up(class_count, 128)                 # lane-dense head output

    Wout_p = jnp.zeros((H.shape[1], Dhp), jnp.bfloat16).at[:, :Dh].set(
        params["Wout"].astype(jnp.bfloat16))
    bout_p = jnp.zeros((1, Dhp), jnp.float32).at[0, :Dh].set(params["bout"])
    Wsoft_p = jnp.zeros((Dhp, Cpad), jnp.bfloat16).at[:Dh, :class_count].set(
        params["Wsoft"].astype(jnp.bfloat16))
    bmask = jnp.full((1, Cpad), _NEG_BIG, jnp.float32).at[0, :class_count].set(
        params["bsoft"])

    # output GCN layer (2048 -> 32) fused with the tiny H @ Wsoft projection,
    # then head: Q1 @ P + b -> softmax (reassociated from (Q1 @ H) @ Wsoft).
    P = out_layer_project(H, A1b, Wout_p, bout_p, Wsoft_p)   # (N1, Cpad) f32

    N1p = _round_up(N1, 128)
    Q1h = jnp.zeros((HW1p, N1p), jnp.bfloat16).at[:HW1, :N1].set(
        Q1.astype(jnp.bfloat16))
    Pp = jnp.zeros((N1p, Cpad), jnp.bfloat16).at[:N1].set(
        P.astype(jnp.bfloat16))

    Ypad = head(Q1h, Pp, bmask, t1)                    # (HW1p, Cpad) f32
    return Ypad[:HW1, :class_count]


def init_params(key, channel, class_count):
    def lin(k, din, dout):
        kw, kb = jax.random.split(k)
        bound = float(din) ** -0.5
        W = jax.random.uniform(kw, (din, dout), jnp.float32, -bound, bound)
        b = jax.random.uniform(kb, (dout,), jnp.float32, -bound, bound)
        return W, b

    ks = jax.random.split(key, 6)
    p = {}
    p["W1a"], p["b1a"] = lin(ks[0], channel, 512)
    p["W1b"], p["b1b"] = lin(ks[1], 512, 1024)
    p["W2a"], p["b2a"] = lin(ks[2], channel, 512)
    p["W2b"], p["b2b"] = lin(ks[3], 512, 1024)
    p["Wout"], p["bout"] = lin(ks[4], 2048, 32)
    p["Wsoft"], p["bsoft"] = lin(ks[5], 32, class_count)
    return p


if __name__ == "__main__":
    height, width, channel = 32, 32, 4
    class_count = 4
    n_sp = 16                      # number of superpixels
    HW = height * width

    key = jax.random.PRNGKey(0)
    k_x1, k_x2, k_p = jax.random.split(key, 3)

    x1 = jax.random.normal(k_x1, (height, width, channel), jnp.float32)
    x2 = jax.random.normal(k_x2, (height, width, channel), jnp.float32)

    # pixel -> superpixel assignment matrices (every column nonempty)
    Q1 = jax.nn.one_hot(jnp.arange(HW) % n_sp, n_sp, dtype=jnp.float32)
    Q2 = jax.nn.one_hot((jnp.arange(HW) // 4) % n_sp, n_sp, dtype=jnp.float32)

    # symmetric, zero-diagonal adjacency matrices
    idx = jnp.arange(n_sp)
    diff = jnp.abs(idx[:, None] - idx[None, :])
    A1 = ((diff == 1) | (diff == 2)).astype(jnp.float32)
    A2 = ((diff == 1) | (diff == 3)).astype(jnp.float32)

    params = init_params(k_p, channel, class_count)

    Y = cegcn_forward(params, x1, x2, Q1, A1, Q2, A2, epoch=0, curr_seed=0)
    Y = jax.block_until_ready(Y)

    assert Y.shape == (HW, class_count)
    assert bool(jnp.all(jnp.isfinite(Y)))
    # softmax rows should sum to ~1
    assert bool(jnp.all(jnp.abs(jnp.sum(Y, axis=-1) - 1.0) < 1e-2))
    print("KERNEL_OK")
</pallas_src>

<mosaic_0001>
module attributes {stable_mosaic.version = 11 : i64} {
  func.func @_superpixel_kernel(%arg0: i32, %arg1: i32, %arg2: memref<16x1xf32, #tpu.memory_space<vmem>>, %arg3: memref<16x512xbf16, #tpu.memory_space<vmem>>, %arg4: memref<512x128xbf16, #tpu.memory_space<vmem>>, %arg5: memref<16x128xf32, #tpu.memory_space<vmem>>) attributes {dimension_semantics = [#tpu.dimension_semantics<parallel>, #tpu.dimension_semantics<arbitrary>], iteration_bounds = array<i64: 1, 2>, scalar_prefetch = 0 : i64, scratch_operands = 0 : i64, tpu.core_type = #tpu.core_type<tc>, window_params = [{pipeline_mode = #tpu.pipeline_mode<synchronous>, transform_indices = @transform_0, window_bounds = array<i64: 16, 1>}, {transform_indices = @transform_1, window_bounds = array<i64: 16, 512>}, {transform_indices = @transform_2, window_bounds = array<i64: 512, 128>}, {transform_indices = @transform_3, window_bounds = array<i64: 16, 128>}]} {
    %c0_i32 = arith.constant 0 : i32
    %0 = arith.cmpi eq, %arg1, %c0_i32 : i32
    %1 = arith.extui %0 : i1 to i32
    %c0_i32_0 = arith.constant 0 : i32
    %2 = arith.cmpi ne, %1, %c0_i32_0 : i32
    scf.if %2 {
      %cst_9 = arith.constant 0.000000e+00 : f32
      %12 = vector.broadcast %cst_9 : f32 to vector<16x128xf32>
      %c0_10 = arith.constant 0 : index
      %c0_11 = arith.constant 0 : index
      %13 = vector.load %arg5[%c0_10, %c0_11] : memref<16x128xf32, #tpu.memory_space<vmem>>, vector<16x128xf32>
      tpu.vector_store %arg5[%c0_10, %c0_11], %12 {strides = array<i32>} : memref<16x128xf32, #tpu.memory_space<vmem>>, vector<16x128xf32>,
    } else {
    }
    %c0 = arith.constant 0 : index
    %c0_1 = arith.constant 0 : index
    %3 = vector.load %arg5[%c0, %c0_1] : memref<16x128xf32, #tpu.memory_space<vmem>>, vector<16x128xf32>
    %c0_2 = arith.constant 0 : index
    %c0_3 = arith.constant 0 : index
    %4 = vector.load %arg3[%c0_2, %c0_3] : memref<16x512xbf16, #tpu.memory_space<vmem>>, vector<16x512xbf16>
    %c0_4 = arith.constant 0 : index
    %c0_5 = arith.constant 0 : index
    %5 = vector.load %arg4[%c0_4, %c0_5] : memref<512x128xbf16, #tpu.memory_space<vmem>>, vector<512x128xbf16>
    %cst = arith.constant dense<0.000000e+00> : vector<16x128xf32>
    %6 = tpu.matmul %4, %5, %cst {dimension_numbers = #tpu.dot_dimension_numbers<[1], [0], [0], [1], [0, 0, 1, 1], [], []>} : vector<16x512xbf16>, vector<512x128xbf16>, vector<16x128xf32> -> vector<16x128xf32>
    %7 = arith.addf %3, %6 : vector<16x128xf32>
    %c0_6 = arith.constant 0 : index
    %c0_7 = arith.constant 0 : index
    %8 = vector.load %arg5[%c0_6, %c0_7] : memref<16x128xf32, #tpu.memory_space<vmem>>, vector<16x128xf32>
    tpu.vector_store %arg5[%c0_6, %c0_7], %7 {strides = array<i32>} : memref<16x128xf32, #tpu.memory_space<vmem>>, vector<16x128xf32>,
    %c1_i32 = arith.constant 1 : i32
    %9 = arith.cmpi eq, %arg1, %c1_i32 : i32
    %10 = arith.extui %9 : i1 to i32
    %c0_i32_8 = arith.constant 0 : i32
    %11 = arith.cmpi ne, %10, %c0_i32_8 : i32
    scf.if %11 {
      %c0_9 = arith.constant 0 : index
      %c0_10 = arith.constant 0 : index
      %12 = vector.load %arg5[%c0_9, %c0_10] : memref<16x128xf32, #tpu.memory_space<vmem>>, vector<16x128xf32>
      %c0_11 = arith.constant 0 : index
      %c0_12 = arith.constant 0 : index
      %13 = vector.load %arg2[%c0_11, %c0_12] : memref<16x1xf32, #tpu.memory_space<vmem>>, vector<16x1xf32>
      %14 = vector.broadcast %13 : vector<16x1xf32> to vector<16x128xf32>
      %15 = arith.mulf %12, %14 : vector<16x128xf32>
      %c0_13 = arith.constant 0 : index
      %c0_14 = arith.constant 0 : index
      %16 = vector.load %arg5[%c0_13, %c0_14] : memref<16x128xf32, #tpu.memory_space<vmem>>, vector<16x128xf32>
      tpu.vector_store %arg5[%c0_13, %c0_14], %15 {strides = array<i32>} : memref<16x128xf32, #tpu.memory_space<vmem>>, vector<16x128xf32>,
    } else {
    }
    return
  }
  func.func @transform_0(%arg0: i32, %arg1: i32) -> (i32, i32) {
    %c0_i32 = arith.constant 0 : i32
    %c0_i32_0 = arith.constant 0 : i32
    %c0_i32_1 = arith.constant 0 : i32
    return %c0_i32, %c0_i32_0 : i32, i32
  }
  func.func @transform_1(%arg0: i32, %arg1: i32) -> (i32, i32) {
    %c0_i32 = arith.constant 0 : i32
    %c0_i32_0 = arith.constant 0 : i32
    return %c0_i32, %arg1 : i32, i32
  }
  func.func @transform_2(%arg0: i32, %arg1: i32) -> (i32, i32) {
    %c0_i32 = arith.constant 0 : i32
    return %arg1, %arg0 : i32, i32
  }
  func.func @transform_3(%arg0: i32, %arg1: i32) -> (i32, i32) {
    %c0_i32 = arith.constant 0 : i32
    %c0_i32_0 = arith.constant 0 : i32
    return %c0_i32, %arg0 : i32, i32
  }
}

</mosaic_0001>

<bundles_post_ra>
// kernel: tpu_custom_call.1
= control target key start
LH: loop header
LB: loop body
LE: loop exit
PB: predicated region body
PF: predicated region fallthrough
CT: control target
= control target key end

     0   :  { %8 = vsyncpa [#allocation3], 0  ;;  %s1331_s0 = inlined_call_operand.vmem [shape: f32[16,1], index: 0, kind: input, shape index: {}]   ;;  %s1332_s1 = inlined_call_operand.hbm [shape: bf16[16,1024], index: 1, kind: input, shape index: {}]   ;;  %s1333_s2 = inlined_call_operand.hbm [shape: bf16[1024,128], index: 2, kind: input, shape index: {}]   ;;  %s1334_s3 = inlined_call_operand.hbm [shape: f32[16,128], index: 3, kind: output, shape index: {}]  }
   0x1   :  { %10 = vsyncpa [#allocation3 + $0x1], 0 }
   0x2   :  { %11 = vsyncpa [#allocation6], 0 }
   0x3   :  { %13 = vsyncpa [#allocation6 + $0x1], 0 }
   0x4   :  { %14 = vsyncpa [#allocation4], 0  ;;  %s1167_s12 = smov 0   ;;  %s1169_s13 = smov 0  }
   0x5   :  { %s1171_s14 = smov 0   ;;  %s1173_s15 = smov 0  }
   0x6   :  { %s1175_s16 = smov 0   ;;  %s1177_s17 = smov 0  }
   0x7 LB: > { %s1335_s18 = sadd.s32 4294967295, %s1135_s17   ;;  %s29_s19 = sadd.s32 1, %s1131_s16  ;;  %s1135_s17 = sphi %s1177_s17, %s20_s17   ;;  %s1131_s16 = sphi %s1175_s16, %s1344_s16   ;;  %s1127_s15 = sphi %s1173_s15, %s1343_s15   ;;  %s1123_s14 = sphi %s1171_s14, %s1342_s14   ;;  %s1119_s13 = sphi %s1169_s13, %s1341_s13   ;;  %s1115_s12 = sphi %s1167_s12, %s1340_s12  }
   0x8   : > { %p30_p0 = scmp.ge.s32.totalorder %s29_s19, 2  ;;  %s60_s20 = sadd.s32 1, %s1123_s14 }
   0x9   : > { %p67_p1 = scmp.ne.s32.totalorder %s1123_s14, %s1119_s13  ;;  %p68_p2 = scmp.eq.s32.totalorder %s1135_s17, 0 }
   0xa   : > { %s1346_s19 = smov (%p30_p0, %s29_s19), 0  ;;  %p73_p4 = scmp.ne.s32.totalorder %s1119_s13, %s1115_s12 }
   0xb   : > { %p1203_p3 = por %p68_p2, %p67_p1  ;;  %s57_s22 = ssub.s32 %s1131_s16, %s1346_s19 }
   0xc   : > { %p74_p5 = scmp.eq.s32.totalorder %s1335_s18, 0  ;;  %p58_p6 = scmp.eq.s32.totalorder %s57_s22, 0 }
   0xd   : > { %p927_p8 = scmp.lt.s32.totalorder %s1135_s17, 2  ;;  %s1221_s25 = sand.u32 1, %s1123_s14  }
   0xe   : > { %p1212_p7 = por %p74_p5, %p73_p4  ;;  %s874_s26 = sshll.u32 %s1131_s16, 4 }
   0xf   : > { %s1218_s24 = scalar_select %p58_p6, %s1123_s14, %s60_s20  }
  0x10   : > { %s715_s27 = sshll.u32 %s1221_s25, 5  ;;  %s163_s30 = scalar_lea.hbm %s1332_s1, %s874_s26 }
  0x11   : > { %s164_s4 = sshll.u32 %s163_s30, 4  ;;  %s158_s5 = scalar_lea.vmem [#allocation2], %s715_s27  ;;  %s165_s4 = int_to_ptr.hbm [resolvable:$true] %s164_s4 }
  0x12   : > { %s166_s6 = sshll.u32 %s158_s5, 4  ;;  %p1230_p9 = pnand %p927_p8, %p1203_p3  ;;  %s167_s6 = int_to_ptr.vmem [resolvable:$true] %s166_s6 }
  0x13   : > { %p721_p10 = scmp.ge.s32.totalorder %s1135_s17, 1  ;;  %s155_s8 = scalar_lea.sflag [#allocation3], %s1221_s25 }
  0x14   : > { %s1137_s9 = smov 512   ;;  %s1138_s10 = smov 256  }
  0x15   : > { %s1139_s11 = smov 16   ;;  %p197_p11 = scmp.lt.s32.totalorder %s1135_s17, 3 }
  0x16   : > { %923 = dma.hbm_to_vmem [thread:$0]  (!%p1230_p9), %s165_s4, 512, %s167_s6, %s155_s8, %s1137_s9, %s1138_s10, %s1139_s11  }
  0x17   : > { %s718_s12 = sshll.u32 %s1221_s25, 8  ;;  %s875_s20 = sshll.u32 %s1131_s16, 8 }
  0x18   : > { %p198_p12 = pnand %p721_p10, %p197_p11  ;;  %s186_s26 = scalar_lea.hbm %s1333_s2, %s875_s20 }
  0x19   : > { %s180_s27 = scalar_lea.vmem [#allocation5], %s718_s12  ;;  %s187_s29 = sshll.u32 %s186_s26, 4  ;;  %s188_s29 = int_to_ptr.hbm [resolvable:$true] %s187_s29 }
  0x1a   : > { %s189_s28 = sshll.u32 %s180_s27, 4  ;;  %s177_s30 = scalar_lea.sflag [#allocation6], %s1221_s25  ;;  %s190_s28 = int_to_ptr.vmem [resolvable:$true] %s189_s28 }
  0x1b   : > { %s1140_s5 = smov 64   ;;  %s1141_s18 = smov 4  }
  0x1c   : > { %926 = dma.hbm_to_vmem [thread:$0]  (!%p1230_p9), %s188_s29, 4096, %s190_s28, %s177_s30, %s1140_s5, %s1140_s5, %s1141_s18  }
  0x1d   : > { %201 = sbr.rel (%p198_p12) target bundleno = 364 (0x16c), region = 32  ;;  %s203_s4 = sand.u32 (!%p198_p12), 1, %s1119_s13  }
  0x1e   : > { %s722_s6 = sshll.u32 (!%p198_p12), %s203_s4, 5  ;;  %s204_s8 = scalar_lea.sflag (!%p198_p12), [#allocation3], %s203_s4 }
  0x1f   : > { %s1248_s9 = scalar_lea.vmem (!%p198_p12), [#allocation2], %s722_s6 }
  0x22   : > { %1102 = dma.done.wait (%p1212_p7), %s204_s8, 512  }
  0x23   : > { %1104 = vsyncadd (%p1212_p7), %s204_s8, 4294966784  ;;  %s723_s10 = sshll.u32 %s203_s4, 8  ;;  %s214_s25 = scalar_lea.sflag [#allocation6], %s203_s4 }
  0x24   : > { %s1254_s11 = scalar_lea.vmem [#allocation5], %s723_s10 }
  0x25   : > { %1106 = dma.done.wait (%p1212_p7), %s214_s25, 4096  }
  0x26   : > { %1108 = vsyncadd (%p1212_p7), %s214_s25, 4294963200  ;;  %p724_p13 = scmp.ne.s32.totalorder %s1127_s15, 0 }
  0x28   : > { %246 = sbr.rel (%p724_p13) target bundleno = 48 (0x30), region = 44 }
  0x2d   : > { %v1142_v0 = vmov 0.0  }
  0x2e   : > { %247 = vst [vmem:[#allocation7] sm:$0xff] %v1142_v0 }
  0x2f   : > { %248 = vst [vmem:[#allocation7 + $0x8] sm:$0xff] %v1142_v0 }
  0x30 PF: > { %v887_v1 = vld [vmem:[%s1254_s11 + $0x38] sm:$0xff]  ;;  %v886_v5 = vld [vmem:[%s1254_s11 + $0x30] sm:$0xff]  ;;  %v885_v9 = vld [vmem:[%s1254_s11 + $0x28] sm:$0xff]  ;;  %p869_p0 = scmp.ne.s32.totalorder %s1127_s15, 1 }
  0x31   : > { %v895_v2 = vld [vmem:[%s1254_s11 + $0x78] sm:$0xff]  ;;  %531 = vmatpush.bf16.msra.mxu0 %v887_v1  ;;  %v894_v6 = vld [vmem:[%s1254_s11 + $0x70] sm:$0xff]  ;;  %v893_v10 = vld [vmem:[%s1254_s11 + $0x68] sm:$0xff] }
  0x32   : > { %v903_v3 = vld [vmem:[%s1254_s11 + $0xb8] sm:$0xff]  ;;  %545 = vmatpush.bf16.msra.mxu1 %v895_v2  ;;  %v902_v7 = vld [vmem:[%s1254_s11 + $0xb0] sm:$0xff]  ;;  %v901_v11 = vld [vmem:[%s1254_s11 + $0xa8] sm:$0xff] }
  0x33   : > { %v911_v4 = vld [vmem:[%s1254_s11 + $0xf8] sm:$0xff]  ;;  %559 = vmatpush.bf16.msra.mxu2 %v903_v3  ;;  %v910_v8 = vld [vmem:[%s1254_s11 + $0xf0] sm:$0xff]  ;;  %v909_v12 = vld [vmem:[%s1254_s11 + $0xe8] sm:$0xff] }
  0x34   : > { %573 = vmatpush.bf16.msra.mxu3 %v911_v4  ;;  %v884_v13 = vld [vmem:[%s1254_s11 + $0x20] sm:$0xff]  ;;  %v883_v17 = vld [vmem:[%s1254_s11 + $0x18] sm:$0xff]  ;;  %v882_v21 = vld [vmem:[%s1254_s11 + $0x10] sm:$0xff] }
  0x35   : > { %532 = vmatpush.bf16.msra.mxu0 %v886_v5  ;;  %v892_v14 = vld [vmem:[%s1254_s11 + $0x60] sm:$0xff]  ;;  %v891_v18 = vld [vmem:[%s1254_s11 + $0x58] sm:$0xff]  ;;  %v890_v22 = vld [vmem:[%s1254_s11 + $0x50] sm:$0xff] }
  0x36   : > { %546 = vmatpush.bf16.msra.mxu1 %v894_v6  ;;  %v900_v15 = vld [vmem:[%s1254_s11 + $0xa0] sm:$0xff]  ;;  %v899_v19 = vld [vmem:[%s1254_s11 + $0x98] sm:$0xff]  ;;  %v898_v23 = vld [vmem:[%s1254_s11 + $0x90] sm:$0xff] }
  0x37   : > { %560 = vmatpush.bf16.msra.mxu2 %v902_v7  ;;  %v908_v16 = vld [vmem:[%s1254_s11 + $0xe0] sm:$0xff]  ;;  %v907_v20 = vld [vmem:[%s1254_s11 + $0xd8] sm:$0xff]  ;;  %v906_v24 = vld [vmem:[%s1254_s11 + $0xd0] sm:$0xff] }
  0x38   : > { %574 = vmatpush.bf16.msra.mxu3 %v910_v8  ;;  %v881_v25 = vld [vmem:[%s1254_s11 + $0x8] sm:$0xff]  ;;  %v880_v29 = vld [vmem:[%s1254_s11] sm:$0xff]  ;;  %v878_v34 = vld [vmem:[%s1248_s9 + $0xc] sm:$0xf0] }
  0x39   : > { %533 = vmatpush.bf16.msra.mxu0 %v885_v9  ;;  %v889_v26 = vld [vmem:[%s1254_s11 + $0x48] sm:$0xff]  ;;  %v888_v30 = vld [vmem:[%s1254_s11 + $0x40] sm:$0xff]  ;;  %v729_v36 = vld [vmem:[%s1248_s9 + $0x10] sm:$0xf0] }
  0x3a   : > { %547 = vmatpush.bf16.msra.mxu1 %v893_v10  ;;  %v897_v27 = vld [vmem:[%s1254_s11 + $0x88] sm:$0xff]  ;;  %v896_v31 = vld [vmem:[%s1254_s11 + $0x80] sm:$0xff]  ;;  %v879_v38 = vld [vmem:[%s1248_s9 + $0x14] sm:$0xf0] }
  0x3b   : > { %561 = vmatpush.bf16.msra.mxu2 %v901_v11  ;;  %v905_v28 = vld [vmem:[%s1254_s11 + $0xc8] sm:$0xff]  ;;  %v904_v32 = vld [vmem:[%s1254_s11 + $0xc0] sm:$0xff]  ;;  %v737_v40 = vld [vmem:[%s1248_s9 + $0x18] sm:$0xf0] }
  0x3c   : > { %575 = vmatpush.bf16.msra.mxu3 %v909_v12  ;;  %v727_v33 = vld [vmem:[%s1248_s9] sm:$0xf]  ;;  %v876_v35 = vld [vmem:[%s1248_s9 + $0x4] sm:$0xf]  ;;  %v735_v37 = vld [vmem:[%s1248_s9 + $0x8] sm:$0xf] }
  0x3d   : > { %534 = vmatpush.bf16.msra.mxu0 %v884_v13  ;;  %v877_v39 = vld [vmem:[%s1248_s9 + $0xc] sm:$0xf]  ;;  %v728_v41 = vor.u32 %v878_v34, %v727_v33  ;;  %v732_v42 = vor.u32 %v876_v35, %v729_v36  ;;  %v736_v43 = vor.u32 %v879_v38, %v735_v37  ;;  %v249_v51 = vld [vmem:[#allocation7] sm:$0xff] }
  0x3e   : > { %548 = vmatpush.bf16.msra.mxu1 %v892_v14  ;;  %v740_v44 = vor.u32 %v877_v39, %v737_v40  ;;  %v250_v59 = vld [vmem:[#allocation7 + $0x8] sm:$0xff] }
  0x3f   : > { %562 = vmatpush.bf16.msra.mxu2 %v900_v15 }
  0x40   : > { %576 = vmatpush.bf16.msra.mxu3 %v908_v16 }
  0x41   : > { %535 = vmatpush.bf16.msra.mxu0 %v883_v17 }
  0x42   : > { %549 = vmatpush.bf16.msra.mxu1 %v891_v18 }
  0x43   : > { %563 = vmatpush.bf16.msra.mxu2 %v899_v19 }
  0x44   : > { %577 = vmatpush.bf16.msra.mxu3 %v907_v20 }
  0x45   : > { %536 = vmatpush.bf16.msra.mxu0 %v882_v21 }
  0x46   : > { %550 = vmatpush.bf16.msra.mxu1 %v890_v22 }
  0x47   : > { %564 = vmatpush.bf16.msra.mxu2 %v898_v23 }
  0x48   : > { %578 = vmatpush.bf16.msra.mxu3 %v906_v24 }
  0x49   : > { %537 = vmatpush.bf16.msra.mxu0 %v881_v25 }
  0x4a   : > { %551 = vmatpush.bf16.msra.mxu1 %v889_v26 }
  0x4b   : > { %565 = vmatpush.bf16.msra.mxu2 %v897_v27 }
  0x4c   : > { %579 = vmatpush.bf16.msra.mxu3 %v905_v28 }
  0x4d   : > { %538 = vmatpush.bf16.msra.mxu0 %v880_v29 }
  0x4e   : > { %552 = vmatpush.bf16.msra.mxu1 %v888_v30 }
  0x4f   : > { %566 = vmatpush.bf16.msra.mxu2 %v896_v31 }
  0x50   : > { %580 = vmatpush.bf16.msra.mxu3 %v904_v32  ;;  %539 = vmatmul.bf16.vlgmr.msra.gmra.mxu0 %v728_v41 }
  0x51   : > { %553 = vmatmul.bf16.vlgmr.msra.gmra.mxu1 %v732_v42 }
  0x52   : > { %567 = vmatmul.bf16.vlgmr.msra.gmra.mxu2 %v736_v43 }
  0x53   : > { %581 = vmatmul.bf16.vlgmr.msra.gmra.mxu3 %v740_v44 }
  0xcd   : > { %v540_v45 = vpop.f32.mrf.mxu0 }
  0xce   : > { %v554_v46 = vpop.f32.mrf.mxu1 }
  0xcf   : > { %v555_v47 = vadd.f32 %v554_v46, %v540_v45 }
  0xd5   : > { %v568_v48 = vpop.f32.mrf.mxu2  ;;  %v542_v53 = vpop.f32.mrf.mxu0 }
  0xd6   : > { %v582_v49 = vpop.f32.mrf.mxu3  ;;  %v569_v50 = vadd.f32 %v568_v48, %v555_v47  ;;  %v556_v54 = vpop.f32.mrf.mxu1 }
  0xd7   : > { %v557_v56 = vadd.f32 %v556_v54, %v542_v53 }
  0xd8   : > { %v583_v52 = vadd.f32 %v582_v49, %v569_v50 }
  0xda   : > { %v587_v55 = vadd.f32 %v583_v52, %v249_v51 }
  0xdc   : > { %589 = vst [vmem:[#allocation7] sm:$0xff] %v587_v55 }
  0xdd   : > { %v570_v57 = vpop.f32.mrf.mxu2 }
  0xde   : > { %v571_v58 = vadd.f32 %v570_v57, %v557_v56  ;;  %v584_v60 = vpop.f32.mrf.mxu3 }
  0xe0   : > { %v585_v61 = vadd.f32 %v584_v60, %v571_v58  ;;  %594 = sbr.rel (%p869_p0) target bundleno = 357 (0x165), region = 48 }
  0xe2   : > { %v588_v62 = vadd.f32 %v585_v61, %v250_v59 }
  0xe4   : > { %590 = vst [vmem:[#allocation7 + $0x8] sm:$0xff] %v588_v62 }
  0xe5   : > { %v597_v63 = vld [vmem:[%s1331_s0] sm:$0xff]  ;;  %v1143_v0 = vmov 0   ;;  %v598_v1 = vld [vmem:[%s1331_s0 + $0x8] sm:$0xff] }
  0xe6   : > { %988 = vset.pattern.permute.xlu0 %v1143_v0  ;;  %v595_v2 = vld [vmem:[#allocation7] sm:$0xff] }
  0xe7   : > { %601 = vperm.xlu0 %988, %v597_v63  }
  0xeb   : > { %v596_v5 = vld [vmem:[#allocation7 + $0x8] sm:$0xff] }
  0xef   : > { %606 = vperm.xlu0 %988, %v598_v1  }
 0x159   : > { %v602_v3 = vpop.permute.xlu0 %601 }
 0x15a   : > { %v609_v4 = vmul.f32 %v602_v3, %v595_v2 }
 0x15c   : > { %611 = vst [vmem:[#allocation7] sm:$0xff] %v609_v4 }
 0x161   : > { %v607_v6 = vpop.permute.xlu0 %606 }
 0x162   : > { %v610_v7 = vmul.f32 %v607_v6, %v596_v5 }
 0x164   : > { %612 = vst [vmem:[#allocation7 + $0x8] sm:$0xff] %v610_v7 }
 0x165 PF: > { %s1339_s15 = sadd.s32 4294967295, %s1135_s17   ;;  %s622_s21 = sshll.u32 %s1334_s3, 4  ;;  %s623_s21 = int_to_ptr.hbm [resolvable:$true] %s622_s21 }
 0x166   : > { %p928_p1 = scmp.eq.s32.totalorder %s1339_s15, 1  ;;  %s1144_s26 = smov [#allocation7]  }
 0x167   : > { %s620_s27 = sshll.u32 %s1144_s26, 4  ;;  %s1145_s28 = smov 128   ;;  %s621_s27 = int_to_ptr.vmem [resolvable:$true] %s620_s27 }
 0x168   : > { %s1146_s29 = smov 8  }
 0x169   : > { %917 = dma.vmem_to_hbm [thread:$0]  (%p928_p1), %s621_s27, 256, %s623_s21, [#allocation4], %s1145_s28, %s1145_s28, %s1146_s29  }
 0x16a   : > { %1110 = dma.done.wait (%p928_p1), [#allocation4], 256  }
 0x16b   : > { %1112 = vsyncadd (%p928_p1), [#allocation4], 4294967040 }
 0x16c PF: > { %s20_s17 = sadd.s32 1, %s1135_s17   ;;  %s1340_s12 = smov %s1119_s13 }
 0x16d   : > { %p17_p2 = scmp.ge.s32.totalorder %s20_s17, 4   ;;  %s1341_s13 = smov %s1123_s14 }
 0x16e   : > { %s1342_s14 = smov %s1218_s24  ;;  %s1343_s15 = smov %s1131_s16 }
 0x16f   : > { %s1344_s16 = smov %s1346_s19  ;;  %19 = sbr.rel (!%p17_p2) target bundleno = 7 (0x7), region = 91 }
 0x174   :  { %639 = vsyncpa [#allocation3], 1 }
 0x175   :  { %641 = vsyncpa [#allocation3 + $0x1], 1 }
 0x176   :  { %642 = vsyncpa [#allocation6], 1 }
 0x177   :  { %644 = vsyncpa [#allocation6 + $0x1], 1 }
 0x178   :  { %645 = vsyncpa [#allocation4], 1 }
 0x179   :  { %647 = vsyncpa [#allocation4 + $0x1], 1 }

</bundles_post_ra>
